<compile_context>
chip_gen: v7x
topology: tpu7x:2x2x1
jax: 0.10.0
libtpu: 0.0.40
codegen_flags: <defaults>
</compile_context>

<pallas_src>
import jax
import jax.numpy as jnp
from jax.experimental import pallas as pl
from jax.experimental.pallas import tpu as pltpu


# ----------------------------------------------------------------------------
# Kernel
# ----------------------------------------------------------------------------
def ae_encoder_kernel(x_ref,
                      w1_ref, b1_ref,
                      w2_ref, b2_ref,
                      w3_ref, b3_ref,
                      wz_ref, bz_ref,
                      out_ref):
    """Fused MLP encoder: 3 x (Linear -> LeakyReLU(0.2)) then final Linear."""

    def linear(h_bf16, w_ref, b_ref):
        # bf16 x bf16 -> f32 accumulate on the MXU, f32 bias add on the VPU.
        return (jnp.dot(h_bf16, w_ref[...], preferred_element_type=jnp.float32)
                + b_ref[...])

    def leaky_relu(h):
        # max(h, 0.2*h) == LeakyReLU(0.2); one fewer VPU op than where().
        return jnp.maximum(h, 0.2 * h)

    # f32 -> bf16 cast in-kernel: x is read from HBM exactly once, as f32.
    h = x_ref[...].astype(jnp.bfloat16)
    h = leaky_relu(linear(h, w1_ref, b1_ref))
    h = leaky_relu(linear(h.astype(jnp.bfloat16), w2_ref, b2_ref))
    h = leaky_relu(linear(h.astype(jnp.bfloat16), w3_ref, b3_ref))
    z_ae = linear(h.astype(jnp.bfloat16), wz_ref, bz_ref)
    out_ref[...] = z_ae.astype(out_ref.dtype)


# ----------------------------------------------------------------------------
# Parameter prep: block-diagonal (lane-folded) bf16 weights, tiled f32 biases.
# Tiny one-off work; hoist out of hot loops if this is called repeatedly.
# ----------------------------------------------------------------------------
def fold_params(params, fold):
    folded = {}
    for name, (w, b) in params.items():
        wb = jax.scipy.linalg.block_diag(*([w] * fold)) if fold > 1 else w
        bb = jnp.tile(b, (1, fold)) if fold > 1 else b
        folded[name] = (wb.astype(jnp.bfloat16), bb.astype(jnp.float32))
    return folded


# ----------------------------------------------------------------------------
# Wrapper
# ----------------------------------------------------------------------------
def ae_encoder(x, params, *, fold=4, tm=512):
    """x: [N, n_input] f32; params: dict name -> (w [in,out] f32, b [1,out] f32).

    Returns z_ae: [N, n_z] f32.
    `tm` is the batch tile in *unfolded* rows; `fold` is the lane-fold factor
    (auto-clamped so folded feature widths stay MXU-sized; 1 disables folding).
    """
    N, n_input = x.shape
    w1, _ = params["enc_1"]
    w2, _ = params["enc_2"]
    w3, _ = params["enc_3"]
    wz, _ = params["z_layer"]
    d1, d2, d3, n_z = w1.shape[1], w2.shape[1], w3.shape[1], wz.shape[1]

    # ---- lane-fold factor: only fold when all feature widths are narrow. ----
    max_dim = max(n_input, d1, d2, d3, n_z)
    fold = max(1, min(int(fold), 256 // max_dim)) if max_dim <= 256 else 1

    # Pad the batch to a multiple of `fold` only (tiny; skipped when possible).
    N_lift = ((N + fold - 1) // fold) * fold
    if N_lift != N:
        x = jnp.pad(x, ((0, N_lift - N), (0, 0)))
    Nf = N_lift // fold
    # Row-major reshape: pure relabeling of the same bytes, no data movement.
    xf = x.reshape(Nf, fold * n_input)

    fp = fold_params(params, fold)
    w1b, b1f = fp["enc_1"]
    w2b, b2f = fp["enc_2"]
    w3b, b3f = fp["enc_3"]
    wzb, bzf = fp["z_layer"]

    # ---- batch-tile selection (in folded rows) -------------------------------
    tm_f = max(8, tm // fold)
    tm_f = (tm_f // 8) * 8                       # sublane (8) alignment
    nf_ceil8 = ((Nf + 7) // 8) * 8
    tm_f = min(tm_f, nf_ceil8)                   # never larger than the batch
    # Keep >= ~4 grid steps when the batch allows, so v7x can shard the
    # 'parallel' axis across its 2 TensorCores and still double-buffer.
    cap = (pl.cdiv(Nf, 4) // 8) * 8
    if cap >= 8:
        tm_f = min(tm_f, cap)

    grid = (pl.cdiv(Nf, tm_f),)                  # ragged last block is fine

    def const_spec(arr):
        # Whole-array block, same block index every grid step -> loop-invariant.
        return pl.BlockSpec(arr.shape, lambda i: (0, 0))

    w_bytes = (w1b.size + w2b.size + w3b.size + wzb.size) * 2
    b_bytes = (b1f.size + b2f.size + b3f.size + bzf.size) * 4
    flops = 2 * Nf * (w1b.size + w2b.size + w3b.size + wzb.size) // 1
    bytes_accessed = xf.size * 4 + w_bytes + b_bytes + Nf * fold * n_z * 4

    out = pl.pallas_call(
        ae_encoder_kernel,
        out_shape=jax.ShapeDtypeStruct((Nf, fold * n_z), jnp.float32),
        grid_spec=pltpu.PrefetchScalarGridSpec(
            num_scalar_prefetch=0,
            grid=grid,
            in_specs=[
                pl.BlockSpec((tm_f, fold * n_input), lambda i: (i, 0)),  # x tile
                const_spec(w1b), const_spec(b1f),
                const_spec(w2b), const_spec(b2f),
                const_spec(w3b), const_spec(b3f),
                const_spec(wzb), const_spec(bzf),
            ],
            out_specs=pl.BlockSpec((tm_f, fold * n_z), lambda i: (i, 0)),
        ),
        compiler_params=pltpu.CompilerParams(
            dimension_semantics=("parallel",),
            vmem_limit_bytes=32 * 1024 * 1024,   # far above actual footprint
        ),
        cost_estimate=pl.CostEstimate(
            flops=flops, transcendentals=0, bytes_accessed=bytes_accessed),
    )(xf, w1b, b1f, w2b, b2f, w3b, b3f, wzb, bzf)

    # Unfold (free reshape) and drop the fold padding rows.
    return out.reshape(N_lift, n_z)[:N]


# ----------------------------------------------------------------------------
# Params + references
# ----------------------------------------------------------------------------
def init_params(key, n_input, ae_n_enc_1, ae_n_enc_2, ae_n_enc_3, n_z):
    """Deterministic parameter init (uniform, a la PyTorch Linear default)."""
    dims = [(n_input, ae_n_enc_1), (ae_n_enc_1, ae_n_enc_2),
            (ae_n_enc_2, ae_n_enc_3), (ae_n_enc_3, n_z)]
    names = ["enc_1", "enc_2", "enc_3", "z_layer"]
    params = {}
    for name, (fan_in, fan_out) in zip(names, dims):
        key, kw, kb = jax.random.split(key, 3)
        bound = 1.0 / jnp.sqrt(fan_in)
        w = jax.random.uniform(kw, (fan_in, fan_out), jnp.float32, -bound, bound)
        b = jax.random.uniform(kb, (1, fan_out), jnp.float32, -bound, bound)
        params[name] = (w, b)
    return params


def _leaky_relu(h):
    return jnp.maximum(h, 0.2 * h)


def ae_encoder_ref_f32(x, params):
    """Pure-f32 reference (matches the PyTorch module semantics)."""
    h = x
    for name in ["enc_1", "enc_2", "enc_3"]:
        w, b = params[name]
        h = _leaky_relu(h @ w + b)
    wz, bz = params["z_layer"]
    return h @ wz + bz


def ae_encoder_ref_bf16(x, params):
    """Reference mirroring the kernel's bf16-input / f32-accumulate quantization."""
    # TODO(synk): if tighter-than-bf16 fidelity to PyTorch f32 is required,
    # keep activations f32 in the kernel and cast only the weights.
    q = lambda a: a.astype(jnp.bfloat16).astype(jnp.float32)
    h = q(x)
    for name in ["enc_1", "enc_2", "enc_3"]:
        w, b = params[name]
        h = q(_leaky_relu(h @ q(w) + b))
    wz, bz = params["z_layer"]
    return h @ q(wz) + bz


# ----------------------------------------------------------------------------
# Demo / self-test
# ----------------------------------------------------------------------------
if __name__ == "__main__":
    N = 20            # not a multiple of 8 (exercises ragged block handling)
    n_input = 32
    ae_n_enc_1 = 64
    ae_n_enc_2 = 64
    ae_n_enc_3 = 32
    n_z = 16

    key = jax.random.PRNGKey(0)
    key, kx = jax.random.split(key)
    x = jax.random.normal(kx, (N, n_input), dtype=jnp.float32)
    params = init_params(key, n_input, ae_n_enc_1, ae_n_enc_2, ae_n_enc_3, n_z)

    # Folded path (fold=4 -> 128/256-lane matmuls).
    z_ae = jax.block_until_ready(ae_encoder(x, params))
    assert z_ae.shape == (N, n_z)

    z_ref_q = ae_encoder_ref_bf16(x, params)
    assert jnp.allclose(z_ae, z_ref_q, atol=1e-4, rtol=1e-4), \
        "mismatch vs bf16-quantized JAX reference (folded path)"

    z_ref = ae_encoder_ref_f32(x, params)
    assert jnp.allclose(z_ae, z_ref, atol=5e-2, rtol=5e-2), \
        "mismatch vs f32 JAX reference"

    # Unfolded path (fold=1) must agree with the same reference.
    z_nofold = jax.block_until_ready(ae_encoder(x, params, fold=1))
    assert jnp.allclose(z_nofold, z_ref_q, atol=1e-4, rtol=1e-4), \
        "mismatch in unfolded (fold=1) path"

    # Multi-step grid with a ragged last block and a fold pad (N2 % 4 != 0).
    key, kx2 = jax.random.split(key)
    N2 = 203
    x2 = jax.random.normal(kx2, (N2, n_input), dtype=jnp.float32)
    z2 = jax.block_until_ready(ae_encoder(x2, params, fold=4, tm=64))
    assert z2.shape == (N2, n_z)
    assert jnp.allclose(z2, ae_encoder_ref_bf16(x2, params), atol=1e-4, rtol=1e-4), \
        "mismatch in multi-tile ragged grid path"

    print("KERNEL_OK")
</pallas_src>

<mosaic_0001>
module attributes {stable_mosaic.version = 11 : i64} {
  func.func @ae_encoder_kernel(%arg0: i32, %arg1: memref<8x128xf32, #tpu.memory_space<vmem>>, %arg2: memref<128x256xbf16, #tpu.memory_space<vmem>>, %arg3: memref<1x256xf32, #tpu.memory_space<vmem>>, %arg4: memref<256x256xbf16, #tpu.memory_space<vmem>>, %arg5: memref<1x256xf32, #tpu.memory_space<vmem>>, %arg6: memref<256x128xbf16, #tpu.memory_space<vmem>>, %arg7: memref<1x128xf32, #tpu.memory_space<vmem>>, %arg8: memref<128x64xbf16, #tpu.memory_space<vmem>>, %arg9: memref<1x64xf32, #tpu.memory_space<vmem>>, %arg10: memref<8x64xf32, #tpu.memory_space<vmem>>) attributes {dimension_semantics = [#tpu.dimension_semantics<parallel>], iteration_bounds = array<i64: 1>, scalar_prefetch = 0 : i64, scratch_operands = 0 : i64, tpu.core_type = #tpu.core_type<tc>, window_params = [{transform_indices = @transform_0, window_bounds = array<i64: 8, 128>}, {pipeline_mode = #tpu.pipeline_mode<synchronous>, transform_indices = @transform_1, window_bounds = array<i64: 128, 256>}, {pipeline_mode = #tpu.pipeline_mode<synchronous>, transform_indices = @transform_2, window_bounds = array<i64: 1, 256>}, {pipeline_mode = #tpu.pipeline_mode<synchronous>, transform_indices = @transform_3, window_bounds = array<i64: 256, 256>}, {pipeline_mode = #tpu.pipeline_mode<synchronous>, transform_indices = @transform_4, window_bounds = array<i64: 1, 256>}, {pipeline_mode = #tpu.pipeline_mode<synchronous>, transform_indices = @transform_5, window_bounds = array<i64: 256, 128>}, {pipeline_mode = #tpu.pipeline_mode<synchronous>, transform_indices = @transform_6, window_bounds = array<i64: 1, 128>}, {pipeline_mode = #tpu.pipeline_mode<synchronous>, transform_indices = @transform_7, window_bounds = array<i64: 128, 64>}, {pipeline_mode = #tpu.pipeline_mode<synchronous>, transform_indices = @transform_8, window_bounds = array<i64: 1, 64>}, {transform_indices = @transform_9, window_bounds = array<i64: 8, 64>}]} {
    %c0 = arith.constant 0 : index
    %c0_0 = arith.constant 0 : index
    %0 = vector.load %arg1[%c0, %c0_0] : memref<8x128xf32, #tpu.memory_space<vmem>>, vector<8x128xf32>
    %1 = arith.truncf %0 : vector<8x128xf32> to vector<8x128xbf16>
    %c0_1 = arith.constant 0 : index
    %c0_2 = arith.constant 0 : index
    %2 = vector.load %arg2[%c0_1, %c0_2] : memref<128x256xbf16, #tpu.memory_space<vmem>>, vector<128x256xbf16>
    %cst = arith.constant dense<0.000000e+00> : vector<8x256xf32>
    %3 = tpu.matmul %1, %2, %cst {dimension_numbers = #tpu.dot_dimension_numbers<[1], [0], [0], [1], [0, 0, 1, 1], [], []>} : vector<8x128xbf16>, vector<128x256xbf16>, vector<8x256xf32> -> vector<8x256xf32>
    %c0_3 = arith.constant 0 : index
    %c0_4 = arith.constant 0 : index
    %4 = vector.load %arg3[%c0_3, %c0_4] : memref<1x256xf32, #tpu.memory_space<vmem>>, vector<1x256xf32>
    %5 = vector.broadcast %4 : vector<1x256xf32> to vector<8x256xf32>
    %6 = arith.addf %3, %5 : vector<8x256xf32>
    %cst_5 = arith.constant 2.000000e-01 : f32
    %7 = vector.broadcast %cst_5 : f32 to vector<8x256xf32>
    %8 = arith.mulf %7, %6 : vector<8x256xf32>
    %9 = arith.maximumf %6, %8 : vector<8x256xf32>
    %10 = arith.truncf %9 : vector<8x256xf32> to vector<8x256xbf16>
    %c0_6 = arith.constant 0 : index
    %c0_7 = arith.constant 0 : index
    %11 = vector.load %arg4[%c0_6, %c0_7] : memref<256x256xbf16, #tpu.memory_space<vmem>>, vector<256x256xbf16>
    %cst_8 = arith.constant dense<0.000000e+00> : vector<8x256xf32>
    %12 = tpu.matmul %10, %11, %cst_8 {dimension_numbers = #tpu.dot_dimension_numbers<[1], [0], [0], [1], [0, 0, 1, 1], [], []>} : vector<8x256xbf16>, vector<256x256xbf16>, vector<8x256xf32> -> vector<8x256xf32>
    %c0_9 = arith.constant 0 : index
    %c0_10 = arith.constant 0 : index
    %13 = vector.load %arg5[%c0_9, %c0_10] : memref<1x256xf32, #tpu.memory_space<vmem>>, vector<1x256xf32>
    %14 = vector.broadcast %13 : vector<1x256xf32> to vector<8x256xf32>
    %15 = arith.addf %12, %14 : vector<8x256xf32>
    %cst_11 = arith.constant 2.000000e-01 : f32
    %16 = vector.broadcast %cst_11 : f32 to vector<8x256xf32>
    %17 = arith.mulf %16, %15 : vector<8x256xf32>
    %18 = arith.maximumf %15, %17 : vector<8x256xf32>
    %19 = arith.truncf %18 : vector<8x256xf32> to vector<8x256xbf16>
    %c0_12 = arith.constant 0 : index
    %c0_13 = arith.constant 0 : index
    %20 = vector.load %arg6[%c0_12, %c0_13] : memref<256x128xbf16, #tpu.memory_space<vmem>>, vector<256x128xbf16>
    %cst_14 = arith.constant dense<0.000000e+00> : vector<8x128xf32>
    %21 = tpu.matmul %19, %20, %cst_14 {dimension_numbers = #tpu.dot_dimension_numbers<[1], [0], [0], [1], [0, 0, 1, 1], [], []>} : vector<8x256xbf16>, vector<256x128xbf16>, vector<8x128xf32> -> vector<8x128xf32>
    %c0_15 = arith.constant 0 : index
    %c0_16 = arith.constant 0 : index
    %22 = vector.load %arg7[%c0_15, %c0_16] : memref<1x128xf32, #tpu.memory_space<vmem>>, vector<1x128xf32>
    %23 = vector.broadcast %22 : vector<1x128xf32> to vector<8x128xf32>
    %24 = arith.addf %21, %23 : vector<8x128xf32>
    %cst_17 = arith.constant 2.000000e-01 : f32
    %25 = vector.broadcast %cst_17 : f32 to vector<8x128xf32>
    %26 = arith.mulf %25, %24 : vector<8x128xf32>
    %27 = arith.maximumf %24, %26 : vector<8x128xf32>
    %28 = arith.truncf %27 : vector<8x128xf32> to vector<8x128xbf16>
    %c0_18 = arith.constant 0 : index
    %c0_19 = arith.constant 0 : index
    %29 = vector.load %arg8[%c0_18, %c0_19] : memref<128x64xbf16, #tpu.memory_space<vmem>>, vector<128x64xbf16>
    %cst_20 = arith.constant dense<0.000000e+00> : vector<8x64xf32>
    %30 = tpu.matmul %28, %29, %cst_20 {dimension_numbers = #tpu.dot_dimension_numbers<[1], [0], [0], [1], [0, 0, 1, 1], [], []>} : vector<8x128xbf16>, vector<128x64xbf16>, vector<8x64xf32> -> vector<8x64xf32>
    %c0_21 = arith.constant 0 : index
    %c0_22 = arith.constant 0 : index
    %31 = vector.load %arg9[%c0_21, %c0_22] : memref<1x64xf32, #tpu.memory_space<vmem>>, vector<1x64xf32>
    %32 = vector.broadcast %31 : vector<1x64xf32> to vector<8x64xf32>
    %33 = arith.addf %30, %32 : vector<8x64xf32>
    %c0_23 = arith.constant 0 : index
    %c0_24 = arith.constant 0 : index
    %34 = vector.load %arg10[%c0_23, %c0_24] : memref<8x64xf32, #tpu.memory_space<vmem>>, vector<8x64xf32>
    tpu.vector_store %arg10[%c0_23, %c0_24], %33 {strides = array<i32>} : memref<8x64xf32, #tpu.memory_space<vmem>>, vector<8x64xf32>,
    return
  }
  func.func @transform_0(%arg0: i32) -> (i32, i32) {
    %c0_i32 = arith.constant 0 : i32
    %c0_i32_0 = arith.constant 0 : i32
    return %arg0, %c0_i32 : i32, i32
  }
  func.func @transform_1(%arg0: i32) -> (i32, i32) {
    %c0_i32 = arith.constant 0 : i32
    %c0_i32_0 = arith.constant 0 : i32
    %c0_i32_1 = arith.constant 0 : i32
    return %c0_i32, %c0_i32_0 : i32, i32
  }
  func.func @transform_2(%arg0: i32) -> (i32, i32) {
    %c0_i32 = arith.constant 0 : i32
    %c0_i32_0 = arith.constant 0 : i32
    %c0_i32_1 = arith.constant 0 : i32
    return %c0_i32, %c0_i32_0 : i32, i32
  }
  func.func @transform_3(%arg0: i32) -> (i32, i32) {
    %c0_i32 = arith.constant 0 : i32
    %c0_i32_0 = arith.constant 0 : i32
    %c0_i32_1 = arith.constant 0 : i32
    return %c0_i32, %c0_i32_0 : i32, i32
  }
  func.func @transform_4(%arg0: i32) -> (i32, i32) {
    %c0_i32 = arith.constant 0 : i32
    %c0_i32_0 = arith.constant 0 : i32
    %c0_i32_1 = arith.constant 0 : i32
    return %c0_i32, %c0_i32_0 : i32, i32
  }
  func.func @transform_5(%arg0: i32) -> (i32, i32) {
    %c0_i32 = arith.constant 0 : i32
    %c0_i32_0 = arith.constant 0 : i32
    %c0_i32_1 = arith.constant 0 : i32
    return %c0_i32, %c0_i32_0 : i32, i32
  }
  func.func @transform_6(%arg0: i32) -> (i32, i32) {
    %c0_i32 = arith.constant 0 : i32
    %c0_i32_0 = arith.constant 0 : i32
    %c0_i32_1 = arith.constant 0 : i32
    return %c0_i32, %c0_i32_0 : i32, i32
  }
  func.func @transform_7(%arg0: i32) -> (i32, i32) {
    %c0_i32 = arith.constant 0 : i32
    %c0_i32_0 = arith.constant 0 : i32
    %c0_i32_1 = arith.constant 0 : i32
    return %c0_i32, %c0_i32_0 : i32, i32
  }
  func.func @transform_8(%arg0: i32) -> (i32, i32) {
    %c0_i32 = arith.constant 0 : i32
    %c0_i32_0 = arith.constant 0 : i32
    %c0_i32_1 = arith.constant 0 : i32
    return %c0_i32, %c0_i32_0 : i32, i32
  }
  func.func @transform_9(%arg0: i32) -> (i32, i32) {
    %c0_i32 = arith.constant 0 : i32
    %c0_i32_0 = arith.constant 0 : i32
    return %arg0, %c0_i32 : i32, i32
  }
}

</mosaic_0001>

<bundles_post_ra>
// kernel: tpu_custom_call.1
= control target key start
LH: loop header
LB: loop body
LE: loop exit
PB: predicated region body
PF: predicated region fallthrough
CT: control target
= control target key end

     0   :  { %14 = vsyncpa [#allocation3], 0  ;;  %s1271_s0 = inlined_call_operand.vmem [shape: f32[5,128], index: 0, kind: input, shape index: {}]   ;;  %s1272_s1 = inlined_call_operand.hbm [shape: bf16[128,256], index: 1, kind: input, shape index: {}]   ;;  %s1273_s2 = inlined_call_operand.vmem [shape: f32[1,256], index: 2, kind: input, shape index: {}]   ;;  %s1274_s3 = inlined_call_operand.hbm [shape: bf16[256,256], index: 3, kind: input, shape index: {}]   ;;  %s1275_s4 = inlined_call_operand.vmem [shape: f32[1,256], index: 4, kind: input, shape index: {}]   ;;  %s1276_s5 = inlined_call_operand.hbm [shape: bf16[256,128], index: 5, kind: input, shape index: {}]   ;;  %s1277_s6 = inlined_call_operand.vmem [shape: f32[1,128], index: 6, kind: input, shape index: {}]   ;;  %s1278_s7 = inlined_call_operand.vmem [shape: bf16[128,64], index: 7, kind: input, shape index: {}]   ;;  %s1279_s8 = inlined_call_operand.vmem [shape: f32[1,64], index: 8, kind: input, shape index: {}]   ;;  %s1280_s9 = inlined_call_operand.hbm [shape: f32[5,64], index: 9, kind: output, shape index: {}]  }
   0x1   :  { %15 = vsyncpa [#allocation6], 0 }
   0x2   :  { %16 = vsyncpa [#allocation4], 0  ;;  %s1116_s30 = smov [#allocation5]   ;;  %s1117_s11 = smov [#allocation2]  }
   0x3   :  { %s38_s10 = sshll.u32 %s1116_s30, 4  ;;  %s24_s12 = sshll.u32 %s1117_s11, 4  ;;  %s39_s10 = int_to_ptr.vmem [resolvable:$true] %s38_s10  ;;  %s1177_s12 = int_to_ptr.vmem [resolvable:$true] %s24_s12 }
   0x4   :  { %s1022_s15 = scalar_lea.hbm %s1274_s3, 4096 }
   0x5   :  { %p1023_p0 = scmp.ne.s32.totalorder %s1274_s3, %s1022_s15  ;;  %p1026_p1 = scmp.lt.u32.totalorder %s1022_s15, %s1274_s3 }
   0x7   :  { %p1028_p2 = pnand %p1026_p1, %p1023_p0 }
   0x9   :  { %1031 = shalt.err (!%p1028_p2)
}
   0xa   :  { %s1032_s20 = scalar_lea.vmem %s39_s10, 4096  ;;  %p1037_p4 = scmp.lt.s32.totalorder %s39_s10, %s39_s10 }
   0xb   :  { %p1033_p3 = scmp.ne.s32.totalorder %s39_s10, %s1032_s20  ;;  %p1038_p5 = scmp.lt.s32.totalorder %s1032_s20, %s1032_s20 }
   0xd   :  { %p1039_p6 = por %p1038_p5, %p1037_p4 }
   0xf   :  { %p1040_p7 = pnand %p1039_p6, %p1033_p3 }
  0x11   :  { %1043 = shalt.err (!%p1040_p7)
}
  0x12   :  { %s1118_s21 = smov 128   ;;  %s1119_s22 = smov 8  }
  0x13   :  { %44 = dma.hbm_to_vmem [thread:$0]  %s1274_s3, 4096, %s39_s10, [#allocation6], %s1118_s21, %s1118_s21, %s1119_s22  }
  0x14   :  { %s1044_s27 = scalar_lea.hbm %s1272_s1, 2048 }
  0x15   :  { %p1045_p8 = scmp.ne.s32.totalorder %s1272_s1, %s1044_s27  ;;  %p1048_p9 = scmp.lt.u32.totalorder %s1044_s27, %s1272_s1 }
  0x17   :  { %p1050_p10 = pnand %p1048_p9, %p1045_p8 }
  0x19   :  { %1053 = shalt.err (!%p1050_p10)
}
  0x1a   :  { %s1054_s13 = scalar_lea.vmem %s1177_s12, 2048  ;;  %p1059_p12 = scmp.lt.s32.totalorder %s1177_s12, %s1177_s12 }
  0x1b   :  { %p1055_p11 = scmp.ne.s32.totalorder %s1177_s12, %s1054_s13  ;;  %p1060_p13 = scmp.lt.s32.totalorder %s1054_s13, %s1054_s13 }
  0x1d   :  { %p1061_p0 = por %p1060_p13, %p1059_p12 }
  0x1f   :  { %p1062_p1 = pnand %p1061_p0, %p1055_p11 }
  0x21   :  { %1065 = shalt.err (!%p1062_p1)
}
  0x22   :  { %30 = dma.hbm_to_vmem [thread:$0]  %s1272_s1, 2048, %s1177_s12, [#allocation3], %s1118_s21, %s1118_s21, %s1119_s22  }
  0x23   :  { %s1120_s14 = smov [#allocation7]   ;;  %s1066_s18 = scalar_lea.hbm %s1276_s5, 2048 }
  0x24   :  { %s52_s15 = sshll.u32 %s1120_s14, 4  ;;  %p1067_p2 = scmp.ne.s32.totalorder %s1276_s5, %s1066_s18  ;;  %s53_s15 = int_to_ptr.vmem [resolvable:$true] %s52_s15 }
  0x25   :  { %p1070_p3 = scmp.lt.u32.totalorder %s1066_s18, %s1276_s5 }
  0x27   :  { %p1072_p4 = pnand %p1070_p3, %p1067_p2 }
  0x29   :  { %1075 = shalt.err (!%p1072_p4)
}
  0x2a   :  { %s1076_s25 = scalar_lea.vmem %s53_s15, 2048  ;;  %p1081_p6 = scmp.lt.s32.totalorder %s53_s15, %s53_s15 }
  0x2b   :  { %p1077_p5 = scmp.ne.s32.totalorder %s53_s15, %s1076_s25  ;;  %p1082_p7 = scmp.lt.s32.totalorder %s1076_s25, %s1076_s25 }
  0x2d   :  { %p1083_p8 = por %p1082_p7, %p1081_p6 }
  0x2f   :  { %p1084_p9 = pnand %p1083_p8, %p1077_p5 }
  0x31   :  { %1087 = shalt.err (!%p1084_p9)
}
  0x32   :  { %s1121_s1 = smov 64   ;;  %s1122_s12 = smov 4  }
  0x33   :  { %58 = dma.hbm_to_vmem [thread:$0]  %s1276_s5, 2048, %s53_s15, [#allocation6], %s1121_s1, %s1121_s1, %s1122_s12  }
  0x34   :  { %1110 = dma.done.wait [#allocation3], 2048  }
  0x35   :  { %1111 = vsyncadd [#allocation3], 4294965248 }
  0x36   :  { %1112 = dma.done.wait [#allocation6], 6144  }
  0x37   :  { %1113 = vsyncadd [#allocation6], 4294961152  ;;  %v1123_v0 = vmov 0   ;;  %v926_v1 = vld [vmem:[#allocation2 + $0x4] ss:$8 sps:$4 sm:$0xff]   ;;  %v1002_v55 = vld [vmem:[#allocation7 + $0x50] sm:$0xff]   ;;  %v95_v62 = vlaneseq }
  0x38   :  { %217 = vmatprep.mubr.bf16.mxu0 %v1123_v0  ;;  %v928_v2 = vld [vmem:[#allocation2] ss:$8 sps:$4 sm:$0xff]   ;;  %185 = vmatprep.subr.bf16.mxu0 %v926_v1  ;;  %v929_v3 = vld [vmem:[#allocation2 + $0x14] ss:$8 sps:$4 sm:$0xff]   ;;  %v931_v4 = vld [vmem:[#allocation2 + $0x10] ss:$8 sps:$4 sm:$0xff]  }
  0x39   :  { %186 = vmatpush1.bf16.msra.mxu0 %v928_v2  ;;  %v932_v5 = vld [vmem:[#allocation2 + $0x24] ss:$8 sps:$4 sm:$0xff]   ;;  %v934_v6 = vld [vmem:[#allocation2 + $0x20] ss:$8 sps:$4 sm:$0xff]   ;;  %v935_v7 = vld [vmem:[#allocation2 + $0x34] ss:$8 sps:$4 sm:$0xff]  }
  0x3a   :  { %187 = vmatprep.subr.bf16.mxu0 %v929_v3  ;;  %v937_v8 = vld [vmem:[#allocation2 + $0x30] ss:$8 sps:$4 sm:$0xff]   ;;  %v938_v9 = vld [vmem:[#allocation2 + $0x44] ss:$8 sps:$4 sm:$0xff]   ;;  %v952_v11 = vld [vmem:[#allocation5] ss:$8 sps:$4 sm:$0xff]  }
  0x3b   :  { %v950_v10 = vld [vmem:[#allocation5 + $0x4] ss:$8 sps:$4 sm:$0xff]   ;;  %v953_v12 = vld [vmem:[#allocation5 + $0x14] ss:$8 sps:$4 sm:$0xff]   ;;  %v940_v13 = vld [vmem:[#allocation2 + $0x40] ss:$8 sps:$4 sm:$0xff]  }
  0x3c   :  { %436 = vmatprep.subr.bf16.mxu1 %v950_v10  ;;  %v955_v14 = vld [vmem:[#allocation5 + $0x10] ss:$8 sps:$4 sm:$0xff]   ;;  %v956_v15 = vld [vmem:[#allocation5 + $0x24] ss:$8 sps:$4 sm:$0xff]   ;;  %v941_v16 = vld [vmem:[#allocation2 + $0x54] ss:$8 sps:$4 sm:$0xff]  }
  0x3d   :  { %188 = vmatpush1.bf16.msra.mxu0 %v931_v4  ;;  %437 = vmatpush1.bf16.msra.mxu1 %v952_v11  ;;  %v943_v17 = vld [vmem:[#allocation2 + $0x50] ss:$8 sps:$4 sm:$0xff]   ;;  %v958_v18 = vld [vmem:[#allocation5 + $0x20] ss:$8 sps:$4 sm:$0xff]   ;;  %v959_v19 = vld [vmem:[#allocation5 + $0x34] ss:$8 sps:$4 sm:$0xff]  }
  0x3e   :  { %189 = vmatprep.subr.bf16.mxu0 %v932_v5  ;;  %438 = vmatprep.subr.bf16.mxu1 %v953_v12  ;;  %v944_v20 = vld [vmem:[#allocation2 + $0x64] ss:$8 sps:$4 sm:$0xff]   ;;  %v946_v21 = vld [vmem:[#allocation2 + $0x60] ss:$8 sps:$4 sm:$0xff]   ;;  %v961_v22 = vld [vmem:[#allocation5 + $0x30] ss:$8 sps:$4 sm:$0xff]  }
  0x3f   :  { %v962_v23 = vld [vmem:[#allocation5 + $0x44] ss:$8 sps:$4 sm:$0xff]   ;;  %v947_v24 = vld [vmem:[#allocation2 + $0x74] ss:$8 sps:$4 sm:$0xff]   ;;  %v949_v25 = vld [vmem:[#allocation2 + $0x70] ss:$8 sps:$4 sm:$0xff]  }
  0x40   :  { %v75_v26 = vld [vmem:[%s1271_s0] sm:$0xff]  ;;  %v965_v28 = vld [vmem:[#allocation5 + $0x54] ss:$8 sps:$4 sm:$0xff]   ;;  %v967_v29 = vld [vmem:[#allocation5 + $0x50] ss:$8 sps:$4 sm:$0xff]   ;;  %v96_v63 = vshrl.u32 %v95_v62, 7 }
  0x41   :  { %190 = vmatpush1.bf16.msra.mxu0 %v934_v6  ;;  %439 = vmatpush1.bf16.msra.mxu1 %v955_v14  ;;  %v964_v27 = vld [vmem:[#allocation5 + $0x40] ss:$8 sps:$4 sm:$0xff]   ;;  %v968_v30 = vld [vmem:[#allocation5 + $0x64] ss:$8 sps:$4 sm:$0xff]   ;;  %v76_v31 = vpack.c.bf16 %v75_v26, %v75_v26  ;;  %v971_v33 = vld [vmem:[#allocation5 + $0x74] ss:$8 sps:$4 sm:$0xff]  }
  0x42   :  { %191 = vmatprep.subr.bf16.mxu0 %v935_v7  ;;  %440 = vmatprep.subr.bf16.mxu1 %v956_v15  ;;  %v970_v32 = vld [vmem:[#allocation5 + $0x60] ss:$8 sps:$4 sm:$0xff]   ;;  %v973_v34 = vld [vmem:[#allocation5 + $0x70] ss:$8 sps:$4 sm:$0xff]   ;;  %v974_v35 = vld [vmem:[#allocation5 + $0x84] ss:$8 sps:$4 sm:$0xff]  }
  0x43   :  { %v976_v36 = vld [vmem:[#allocation5 + $0x80] ss:$8 sps:$4 sm:$0xff]   ;;  %v977_v37 = vld [vmem:[#allocation5 + $0x94] ss:$8 sps:$4 sm:$0xff]   ;;  %v979_v38 = vld [vmem:[#allocation5 + $0x90] ss:$8 sps:$4 sm:$0xff]  }
  0x44   :  { %v980_v39 = vld [vmem:[#allocation5 + $0xa4] ss:$8 sps:$4 sm:$0xff]   ;;  %v982_v40 = vld [vmem:[#allocation5 + $0xa0] ss:$8 sps:$4 sm:$0xff]   ;;  %v983_v41 = vld [vmem:[#allocation5 + $0xb4] ss:$8 sps:$4 sm:$0xff]  }
  0x45   :  { %192 = vmatpush1.bf16.msra.mxu0 %v937_v8  ;;  %441 = vmatpush1.bf16.msra.mxu1 %v958_v18  ;;  %v985_v42 = vld [vmem:[#allocation5 + $0xb0] ss:$8 sps:$4 sm:$0xff]   ;;  %v986_v43 = vld [vmem:[#allocation5 + $0xc4] ss:$8 sps:$4 sm:$0xff]   ;;  %v988_v44 = vld [vmem:[#allocation5 + $0xc0] ss:$8 sps:$4 sm:$0xff]  }
  0x46   :  { %193 = vmatprep.subr.bf16.mxu0 %v938_v9  ;;  %442 = vmatprep.subr.bf16.mxu1 %v959_v19  ;;  %v989_v45 = vld [vmem:[#allocation5 + $0xd4] ss:$8 sps:$4 sm:$0xff]   ;;  %v991_v46 = vld [vmem:[#allocation5 + $0xd0] ss:$8 sps:$4 sm:$0xff]   ;;  %v992_v47 = vld [vmem:[#allocation5 + $0xe4] ss:$8 sps:$4 sm:$0xff]  }
  0x47   :  { %v994_v48 = vld [vmem:[#allocation5 + $0xe0] ss:$8 sps:$4 sm:$0xff]   ;;  %v995_v49 = vld [vmem:[#allocation5 + $0xf4] ss:$8 sps:$4 sm:$0xff]   ;;  %v997_v50 = vld [vmem:[#allocation5 + $0xf0] ss:$8 sps:$4 sm:$0xff]  }
  0x48   :  { %v998_v51 = vld [vmem:[#allocation7 + $0x40] sm:$0xff]   ;;  %v1000_v53 = vld [vmem:[#allocation7 + $0x48] sm:$0xff]   ;;  %v1003_v56 = vld [vmem:[#allocation7 + $0x10] sm:$0xff]   ;;  %v97_v0 = vsub.s32 0, %v96_v63  ;;  %v101_v2 = vsub.s32 1, %v96_v63  ;;  %vm1125_vm0 = vmmov 0  }
  0x49   :  { %194 = vmatpush1.bf16.msra.mxu0 %v940_v13  ;;  %443 = vmatpush1.bf16.msra.mxu1 %v961_v22  ;;  %v999_v52 = vld [vmem:[#allocation7] sm:$0xff]   ;;  %v1001_v54 = vld [vmem:[#allocation7 + $0x8] sm:$0xff]   ;;  %v1004_v57 = vld [vmem:[#allocation7 + $0x58] sm:$0xff]   ;;  %v1124_v22 = vmov 0.0   ;;  %vm772_vm1 = vcmask 523264  }
  0x4a   :  { %195 = vmatprep.subr.bf16.mxu0 %v941_v16  ;;  %444 = vmatprep.subr.bf16.mxu1 %v962_v23  ;;  %v1005_v58 = vld [vmem:[#allocation7 + $0x18] sm:$0xff]   ;;  %v1006_v59 = vld [vmem:[#allocation7 + $0x60] sm:$0xff]   ;;  %v1008_v61 = vld [vmem:[#allocation7 + $0x68] sm:$0xff]  }
  0x4b   :  { %v1007_v60 = vld [vmem:[#allocation7 + $0x20] sm:$0xff]   ;;  %v1010_v18 = vld [vmem:[#allocation7 + $0x70] sm:$0xff]  }
  0x4c   :  { %v93_v1 = vld [vmem:[%s1273_s2] sm:$0x3]  ;;  %v1011_v19 = vld [vmem:[#allocation7 + $0x30] sm:$0xff]  }
  0x4d   :  { %196 = vmatpush1.bf16.msra.mxu0 %v943_v17  ;;  %445 = vmatpush1.bf16.msra.mxu1 %v964_v27  ;;  %v98_v3 = vrot.slane %v93_v1, %v97_v0  ;;  %v102_v4 = vrot.slane %v93_v1, %v101_v2  ;;  %v1009_v17 = vld [vmem:[#allocation7 + $0x28] sm:$0xff]   ;;  %v264_v23 = vld [vmem:[%s1275_s4] sm:$0x3] }
  0x4e   :  { %197 = vmatprep.subr.bf16.mxu0 %v944_v20  ;;  %446 = vmatprep.subr.bf16.mxu1 %v965_v28  ;;  %v1012_v20 = vld [vmem:[#allocation7 + $0x78] sm:$0xff]  }
  0x51   :  { %198 = vmatpush1.bf16.msra.mxu0 %v946_v21  ;;  %447 = vmatpush1.bf16.msra.mxu1 %v967_v29  ;;  %v1013_v21 = vld [vmem:[#allocation7 + $0x38] sm:$0xff]  }
  0x52   :  { %199 = vmatprep.subr.bf16.mxu0 %v947_v24  ;;  %448 = vmatprep.subr.bf16.mxu1 %v968_v30  ;;  %v269_v24 = vrot.slane %v264_v23, %v97_v0 }
  0x55   :  { %200 = vmatpush1.bf16.msra.mxu0 %v949_v25  ;;  %449 = vmatpush1.bf16.msra.mxu1 %v970_v32  ;;  %v273_v25 = vrot.slane %v264_v23, %v101_v2 }
  0x56   :  { %450 = vmatprep.subr.bf16.mxu1 %v971_v33  ;;  %864 = vmatprep.subr.bf16.mxu0 %v998_v51 }
  0x58   :  { %218 = vmatmul.mubr.bf16.vlgmr.msra.gmra.mrb[0].mxu0 %v76_v31 }
  0x59   :  { %451 = vmatpush1.bf16.msra.mxu1 %v973_v34  ;;  %865 = vmatpush3.bf16.msra.mxu0 %v999_v52 }
  0x5a   :  { %452 = vmatprep.subr.bf16.mxu1 %v974_v35  ;;  %866 = vmatprep.subr.bf16.mxu0 %v1000_v53 }
  0x5d   :  { %453 = vmatpush1.bf16.msra.mxu1 %v976_v36  ;;  %867 = vmatpush3.bf16.msra.mxu0 %v1001_v54 }
  0x5e   :  { %454 = vmatprep.subr.bf16.mxu1 %v977_v37  ;;  %868 = vmatprep.subr.bf16.mxu0 %v1002_v55  ;;  %v1014_v37 = vld [vmem:[%s1278_s7] sm:$0xff]  }
  0x61   :  { %455 = vmatpush1.bf16.msra.mxu1 %v979_v38  ;;  %869 = vmatpush3.bf16.msra.mxu0 %v1003_v56  ;;  %v855_v56 = vld [vmem:[%s1279_s8] ss:$0 sm:$0xff] }
  0x62   :  { %456 = vmatprep.subr.bf16.mxu1 %v980_v39  ;;  %870 = vmatprep.subr.bf16.mxu0 %v1004_v57  ;;  %v1015_v39 = vld [vmem:[%s1278_s7 + $0x8] sm:$0xff]  }
  0x65   :  { %457 = vmatpush1.bf16.msra.mxu1 %v982_v40  ;;  %871 = vmatpush3.bf16.msra.mxu0 %v1005_v58  ;;  %v1016_v40 = vld [vmem:[%s1278_s7 + $0x10] sm:$0xff]  }
  0x66   :  { %458 = vmatprep.subr.bf16.mxu1 %v983_v41  ;;  %872 = vmatprep.subr.bf16.mxu0 %v1006_v59  ;;  %v1017_v41 = vld [vmem:[%s1278_s7 + $0x18] sm:$0xff]  }
  0x69   :  { %459 = vmatpush1.bf16.msra.mxu1 %v985_v42  ;;  %873 = vmatpush3.bf16.msra.mxu0 %v1007_v60  ;;  %v1018_v42 = vld [vmem:[%s1278_s7 + $0x20] sm:$0xff]  }
  0x6a   :  { %460 = vmatprep.subr.bf16.mxu1 %v986_v43  ;;  %874 = vmatprep.subr.bf16.mxu0 %v1008_v61  ;;  %v1019_v43 = vld [vmem:[%s1278_s7 + $0x28] sm:$0xff]  }
  0x6d   :  { %461 = vmatpush1.bf16.msra.mxu1 %v988_v44  ;;  %875 = vmatpush3.bf16.msra.mxu0 %v1009_v17  ;;  %v1020_v44 = vld [vmem:[%s1278_s7 + $0x30] sm:$0xff]  }
  0x6e   :  { %462 = vmatprep.subr.bf16.mxu1 %v989_v45  ;;  %876 = vmatprep.subr.bf16.mxu0 %v1010_v18  ;;  %v1021_v45 = vld [vmem:[%s1278_s7 + $0x38] sm:$0xff]   ;;  %s1126_s7 = smov [#allocation8]  }
  0x6f   :  { %s780_s22 = sshll.u32 %s1126_s7, 4  ;;  %s781_s22 = int_to_ptr.vmem [resolvable:$true] %s780_s22 }
  0x70   :  { %p1093_p11 = scmp.lt.s32.totalorder %s781_s22, %s781_s22 }
  0x71   :  { %463 = vmatpush1.bf16.msra.mxu1 %v991_v46  ;;  %877 = vmatpush3.bf16.msra.mxu0 %v1011_v19 }
  0x72   :  { %464 = vmatprep.subr.bf16.mxu1 %v992_v47  ;;  %878 = vmatprep.subr.bf16.mxu0 %v1012_v20  ;;  %v838_v47 = vld [vmem:[%s1277_s6] ss:$0 sm:$0xff]  ;;  %s1088_s6 = scalar_lea.vmem %s781_s22, 128 }
  0x73   :  { %p1089_p10 = scmp.ne.s32.totalorder %s781_s22, %s1088_s6  ;;  %p1094_p12 = scmp.lt.s32.totalorder %s1088_s6, %s1088_s6 }
  0x75   :  { %465 = vmatpush1.bf16.msra.mxu1 %v994_v48  ;;  %879 = vmatpush3.bf16.msra.mxu0 %v1013_v21  ;;  %p1095_p13 = por %p1094_p12, %p1093_p11 }
  0x76   :  { %466 = vmatprep.subr.bf16.mxu1 %v995_v49  ;;  %895 = vmatprep.subr.bf16.mxu0 %v1124_v22 }
  0x77   :  { %p1096_p0 = pnand %p1095_p13, %p1089_p10 }
  0x79   :  { %467 = vmatpush1.bf16.msra.mxu1 %v997_v50 }
 0x12b   :  { %v219_v5 = vpop.f32.mrb[0].mxu0 }
 0x12c   :  { %v220_v6 = vadd.f32 %v219_v5, %v98_v3  ;;  %v221_v7 = vpop.f32.mrb[1].mxu0 }
 0x12d   :  { %v222_v8 = vadd.f32 %v221_v7, %v102_v4  ;;  %v223_v9 = vpop.f32.mrb[2].mxu0 }
 0x12e   :  { %v226_v10 = vmul.f32 0.2, %v220_v6  ;;  %v224_v11 = vpop.f32.mrb[3].mxu0 }
 0x12f   :  { %v227_v12 = vmul.f32 0.2, %v222_v8 }
 0x130   :  { %v228_v13 = vmax.f32 %v220_v6, %v226_v10 }
 0x131   :  { %v229_v14 = vmax.f32 %v222_v8, %v227_v12 }
 0x132   :  { %v230_v16 = vpack.c.bf16 %v228_v13, %v228_v13 }
 0x133   :  { %v231_v15 = vpack.c.bf16 %v229_v14, %v229_v14 }
 0x135   :  { %468 = vmatprep.mubr.bf16.mxu1 %v231_v15 }
 0x136   :  { %469 = vmatmul.mubr.bf16.vlgmr.msra.gmra.mrb[0].mxu1 %v230_v16 }
 0x209   :  { %v470_v26 = vpop.f32.mrb[0].mxu1 }
 0x20a   :  { %v471_v27 = vadd.f32 %v470_v26, %v269_v24  ;;  %v472_v28 = vpop.f32.mrb[1].mxu1 }
 0x20b   :  { %v473_v29 = vadd.f32 %v472_v28, %v273_v25  ;;  %v474_v30 = vpop.f32.mrb[2].mxu1 }
 0x20c   :  { %v477_v31 = vmul.f32 0.2, %v471_v27  ;;  %v475_v32 = vpop.f32.mrb[3].mxu1 }
 0x20d   :  { %v478_v33 = vmul.f32 0.2, %v473_v29 }
 0x20e   :  { %v479_v34 = vmax.f32 %v471_v27, %v477_v31 }
 0x20f   :  { %v480_v35 = vmax.f32 %v473_v29, %v478_v33 }
 0x210   :  { %v481_v38 = vpack.c.bf16 %v479_v34, %v479_v34 }
 0x211   :  { %v482_v36 = vpack.c.bf16 %v480_v35, %v480_v35 }
 0x213   :  { %650 = vmatprep.mubr.bf16.mxu0 %v482_v36 }
 0x214   :  { %651 = vmatmul.mubr.bf16.vlgmr.msra.gmra.mrb[4].mxu0 %v481_v38 }
 0x215   :  { %896 = vmatpush3.bf16.msra.mxu0 %v1014_v37  ;;  %911 = vmatprep.mubr.msk.bf16.mxu0 %vm1125_vm0, %v1124_v22 }
 0x216   :  { %897 = vmatprep.subr.bf16.mxu0 %v1124_v22 }
 0x219   :  { %898 = vmatpush3.bf16.msra.mxu0 %v1015_v39 }
 0x21a   :  { %899 = vmatprep.subr.bf16.mxu0 %v1124_v22 }
 0x21d   :  { %900 = vmatpush3.bf16.msra.mxu0 %v1016_v40 }
 0x21e   :  { %901 = vmatprep.subr.bf16.mxu0 %v1124_v22 }
 0x221   :  { %902 = vmatpush3.bf16.msra.mxu0 %v1017_v41 }
 0x222   :  { %903 = vmatprep.subr.bf16.mxu0 %v1124_v22 }
 0x225   :  { %904 = vmatpush3.bf16.msra.mxu0 %v1018_v42 }
 0x226   :  { %905 = vmatprep.subr.bf16.mxu0 %v1124_v22 }
 0x229   :  { %906 = vmatpush3.bf16.msra.mxu0 %v1019_v43 }
 0x22a   :  { %907 = vmatprep.subr.bf16.mxu0 %v1124_v22 }
 0x22d   :  { %908 = vmatpush3.bf16.msra.mxu0 %v1020_v44 }
 0x22e   :  { %909 = vmatprep.subr.bf16.mxu0 %v1124_v22 }
 0x231   :  { %910 = vmatpush3.bf16.msra.mxu0 %v1021_v45 }
 0x2e7   :  { %v880_v46 = vpop.f32.mrb[4].mxu0 }
 0x2e8   :  { %v881_v48 = vpop.f32.mrb[5].mxu0 }
 0x2e9   :  { %v882_v49 = vadd.f32 %v881_v48, %v880_v46  ;;  %v883_v50 = vpop.f32.mrb[6].mxu0 }
 0x2ea   :  { %v884_v51 = vpop.f32.mrb[7].mxu0 }
 0x2eb   :  { %v653_v52 = vadd.f32 %v882_v49, %v838_v47 }
 0x2ed   :  { %v658_v53 = vmul.f32 0.2, %v653_v52 }
 0x2ef   :  { %v659_v54 = vmax.f32 %v653_v52, %v658_v53 }
 0x2f1   :  { %v660_v55 = vpack.c.bf16 %v659_v54, %v659_v54 }
 0x2f3   :  { %912 = vmatmul.mubr.bf16.vlgmr.msra.gmra.mrb[8].mxu0 %v660_v55 }
 0x3c6   :  { %v766_v57 = vpop.f32.mrb[8].mxu0 }
 0x3c7   :  { %v767_v58 = vadd.f32 %v855_v56, %v766_v57  ;;  %v913_v59 = vpop.f32.mrb[9].mxu0 }
 0x3c8   :  { %v769_v60 = vpop.f32.mrb[10].mxu0 }
 0x3c9   :  { %v914_v61 = vpop.f32.mrb[11].mxu0  ;;  %773 = vst.msk [vmem:[#allocation8] sm:$0xff] %vm772_vm1, %v767_v58 }
 0x3ca   :  { %1099 = shalt.err (!%p1096_p0)
}
 0x3cb   :  { %s1100_s8 = scalar_lea.hbm %s1280_s9, 128 }
 0x3cc   :  { %p1101_p1 = scmp.ne.s32.totalorder %s1280_s9, %s1100_s8  ;;  %p1104_p2 = scmp.lt.u32.totalorder %s1100_s8, %s1280_s9 }
 0x3ce   :  { %p1106_p3 = pnand %p1104_p2, %p1101_p1 }
 0x3d0   :  { %1109 = shalt.err (!%p1106_p3)
}
 0x3d1   :  { %783 = dma.vmem_to_hbm [thread:$0]  %s781_s22, 128, %s1280_s9, [#allocation4]  }
 0x3d2   :  { %1114 = dma.done.wait [#allocation4], 128  }
 0x3d3   :  { %1115 = vsyncadd [#allocation4], 4294967168 }
 0x3d4   :  { %787 = vsyncpa [#allocation3], 1 }
 0x3d5   :  { %788 = vsyncpa [#allocation6], 1 }
 0x3d6   :  { %789 = vsyncpa [#allocation4], 1 }

</bundles_post_ra>
